<compile_context>
chip_gen: v6e
topology: v6e:2x2x1
jax: 0.10.0
libtpu: 0.0.40
codegen_flags: <defaults>
</compile_context>

<pallas_src>
import functools

import jax
import jax.numpy as jnp
from jax import lax
from jax.experimental import pallas as pl
from jax.experimental.pallas import tpu as pltpu

LEAKY_SLOPE = 0.01  # F.leaky_relu default negative_slope


def _fix_input(x):
    # InputFixer modeled as NaN -> 0 (identity on clean inputs).
    return jnp.where(jnp.isnan(x), jnp.zeros_like(x), x)


def _round_up(x, m):
    return ((x + m - 1) // m) * m


def _choose_tile_m(m_rows, tile_m_max):
    """Largest multiple-of-8 row tile <= tile_m_max keeping >=2 grid steps."""
    half = _round_up(max(pl.cdiv(m_rows, 2), 8), 8)
    return max(8, min(_round_up(tile_m_max, 8), half))


def _mlp_res_kernel(x_ref, w_in_ref, b_in_ref, w_res_ref, b_res_ref,
                    w_pr_ref, b_pr_ref, xfix_ref, out_ref, *, nb_layer):
    # x_ref: (tile_m, lookback*fea_dim), f32.  Fused InputFixer: raw x is read
    # once from HBM and the fixed copy is emitted as a second kernel output.
    x = _fix_input(x_ref[...].astype(jnp.float32))
    xfix_ref[...] = x.astype(xfix_ref.dtype)

    w_dtype = w_in_ref.dtype  # bf16 operands -> MXU full rate; f32 accumulate.

    # input_fc
    hid = jnp.dot(x.astype(w_dtype), w_in_ref[...],
                  preferred_element_type=jnp.float32)
    hid = hid + b_in_ref[...]                              # (tile_m, H) f32

    # residual layers: hid = hid + leaky_relu(Linear(hid))
    def body(layer, hid):
        z = jnp.dot(hid.astype(w_dtype), w_res_ref[layer],
                    preferred_element_type=jnp.float32)
        z = z + b_res_ref[layer]                           # (tile_m, H) f32
        return hid + jnp.where(z > 0, z, LEAKY_SLOPE * z)  # f32 VPU path

    hid = lax.fori_loop(0, nb_layer, body, hid, unroll=True)

    # project (output columns padded to a lane-dense multiple of 128)
    out = jnp.dot(hid.astype(w_dtype), w_pr_ref[...],
                  preferred_element_type=jnp.float32)
    out = out + b_pr_ref[...]
    out_ref[...] = out.astype(out_ref.dtype)


def mlp_res_forward(x, params, *, tile_m=512, compute_dtype=jnp.bfloat16):
    """Pallas implementation of MLP_Res.forward.

    x: [B, N, lookback, fea_dim]
    params: dict of pre-transposed ([in, out]) weights/biases (see init_params).
    Returns (forecasts [B, N, lookahead], x_fix [B, N, lookback, fea_dim]).
    """
    B, N, L, F = x.shape
    K = L * F                                   # flattened per-row features
    M = B * N

    w_in, b_in = params["w_in"], params["b_in"]        # (K, H), (1, H)
    w_res, b_res = params["w_res"], params["b_res"]    # (nb, H, H), (nb, 1, H)
    w_pr, b_pr = params["w_pr"], params["b_pr"]        # (H, A), (1, A)
    nb_layer, H, _ = w_res.shape
    A = w_pr.shape[1]
    assert w_in.shape[0] == K, "lookback*fea_dim must equal input_fc in-dim"

    # ---- row tiling: large tile, pad M instead of asserting divisibility ----
    tile_m = _choose_tile_m(M, tile_m)
    M_pad = _round_up(M, tile_m)
    x2d = x.reshape(M, K)
    if M_pad != M:
        x2d = jnp.pad(x2d, ((0, M_pad - M), (0, 0)))

    # ---- lane-dense output: pad lookahead columns up to a multiple of 128 ----
    A_pad = _round_up(A, 128)
    if A_pad != A:
        w_pr = jnp.pad(w_pr, ((0, 0), (0, A_pad - A)))
        b_pr = jnp.pad(b_pr, ((0, 0), (0, A_pad - A)))

    # ---- bf16 matmul operands (weights), f32 biases/elementwise ----
    w_in_c = w_in.astype(compute_dtype)
    w_res_c = w_res.astype(compute_dtype)
    w_pr_c = w_pr.astype(compute_dtype)
    b_in_c = b_in.astype(jnp.float32)
    b_res_c = b_res.astype(jnp.float32)
    b_pr_c = b_pr.astype(jnp.float32)

    # ---- explicit scoped-VMEM budget: 2x IO tiles + 2x weight stack + slack --
    def _nbytes(a):
        return a.size * jnp.dtype(a.dtype).itemsize
    weight_bytes = sum(_nbytes(a) for a in
                       (w_in_c, b_in_c, w_res_c, b_res_c, w_pr_c, b_pr_c))
    io_tile_bytes = tile_m * (K * 4 + K * 4 + A_pad * 4)
    vmem_limit = int(min(64 << 20,
                         max(16 << 20,
                             2 * weight_bytes + 2 * io_tile_bytes + (4 << 20))))

    kernel = functools.partial(_mlp_res_kernel, nb_layer=nb_layer)
    grid = (M_pad // tile_m,)

    xfix2d, out_pad = pl.pallas_call(
        kernel,
        out_shape=(
            jax.ShapeDtypeStruct((M_pad, K), x.dtype),      # fused x_fix
            jax.ShapeDtypeStruct((M_pad, A_pad), x.dtype),  # lane-dense out
        ),
        grid_spec=pltpu.PrefetchScalarGridSpec(
            num_scalar_prefetch=0,
            grid=grid,
            in_specs=[
                pl.BlockSpec((tile_m, K), lambda i: (i, 0)),
                pl.BlockSpec((K, H), lambda i: (0, 0)),
                pl.BlockSpec((1, H), lambda i: (0, 0)),
                pl.BlockSpec((nb_layer, H, H), lambda i: (0, 0, 0)),
                pl.BlockSpec((nb_layer, 1, H), lambda i: (0, 0, 0)),
                pl.BlockSpec((H, A_pad), lambda i: (0, 0)),
                pl.BlockSpec((1, A_pad), lambda i: (0, 0)),
            ],
            out_specs=(
                pl.BlockSpec((tile_m, K), lambda i: (i, 0)),
                pl.BlockSpec((tile_m, A_pad), lambda i: (i, 0)),
            ),
        ),
        compiler_params=pltpu.CompilerParams(
            dimension_semantics=("parallel",),
            vmem_limit_bytes=vmem_limit),
    )(x2d, w_in_c, b_in_c, w_res_c, b_res_c, w_pr_c, b_pr_c)

    forecasts = out_pad[:M, :A].reshape(B, N, A)
    x_fix = xfix2d[:M].reshape(B, N, L, F)
    return forecasts, x_fix


def init_params(key, lookback, hid_dim, lookahead, nb_layer, dtype=jnp.float32):
    """Deterministic PyTorch-Linear-style init, weights stored as [in, out]."""
    ks = jax.random.split(key, 3 + 2 * nb_layer)

    def linear(kw, kb, fan_in, fan_out):
        bound = 1.0 / jnp.sqrt(fan_in)
        w = jax.random.uniform(kw, (fan_in, fan_out), dtype, -bound, bound)
        b = jax.random.uniform(kb, (1, fan_out), dtype, -bound, bound)
        return w, b

    w_in, b_in = linear(ks[0], ks[1], lookback, hid_dim)
    w_res_list, b_res_list = [], []
    for l in range(nb_layer):
        w, b = linear(ks[2 + 2 * l], ks[3 + 2 * l], hid_dim, hid_dim)
        w_res_list.append(w)
        b_res_list.append(b)
    w_pr, b_pr = linear(ks[2 + 2 * nb_layer], jax.random.fold_in(key, 99),
                        hid_dim, lookahead)
    return {
        "w_in": w_in, "b_in": b_in,
        "w_res": jnp.stack(w_res_list), "b_res": jnp.stack(b_res_list),
        "w_pr": w_pr, "b_pr": b_pr,
    }


def _reference(x, params, compute_dtype):
    """Pure-JAX reference mirroring the PyTorch forward / kernel recipe."""
    B, N, L, F = x.shape
    x_fix = _fix_input(x)
    h = x_fix.reshape(B * N, L * F)
    cd = compute_dtype
    hid = jnp.dot(h.astype(cd), params["w_in"].astype(cd),
                  preferred_element_type=jnp.float32) + params["b_in"][0]
    for l in range(params["w_res"].shape[0]):
        z = jnp.dot(hid.astype(cd), params["w_res"][l].astype(cd),
                    preferred_element_type=jnp.float32) + params["b_res"][l, 0]
        hid = hid + jnp.where(z > 0, z, LEAKY_SLOPE * z)
    out = jnp.dot(hid.astype(cd), params["w_pr"].astype(cd),
                  preferred_element_type=jnp.float32) + params["b_pr"][0]
    return out.reshape(B, N, -1), x_fix


if __name__ == "__main__":
    # small config: num_nodes=4, fea_dim=1, lookback=8, hid_dim=32,
    #               lookahead=4, nb_layer=2, batch=2
    B, N, L, FEA = 2, 4, 8, 1
    HID, AHEAD, NB = 32, 4, 2

    key = jax.random.PRNGKey(0)
    kx, kp = jax.random.split(key)
    x = jax.random.normal(kx, (B, N, L, FEA), dtype=jnp.float32)
    params = init_params(kp, L * FEA, HID, AHEAD, NB)

    forecasts, x_fix = jax.jit(mlp_res_forward)(x, params)
    forecasts = jax.block_until_ready(forecasts)
    x_fix = jax.block_until_ready(x_fix)

    assert forecasts.shape == (B, N, AHEAD)
    assert x_fix.shape == (B, N, L, FEA)

    # exact-recipe reference (bf16 matmul operands, f32 accumulation)
    ref_fc, ref_fix = _reference(x, params, jnp.bfloat16)
    assert jnp.allclose(forecasts, ref_fc, atol=1e-4, rtol=1e-4)
    assert jnp.allclose(x_fix, ref_fix)

    # sanity vs full-f32 math (bf16 operand quantization only)
    ref_fc32, _ = _reference(x, params, jnp.float32)
    assert jnp.allclose(forecasts, ref_fc32, atol=5e-2, rtol=5e-2)

    print("KERNEL_OK")
</pallas_src>

<mosaic_0001>
module attributes {stable_mosaic.version = 11 : i64} {
  func.func @_mlp_res_kernel(%arg0: i32, %arg1: memref<8x8xf32, #tpu.memory_space<vmem>>, %arg2: memref<8x32xbf16, #tpu.memory_space<vmem>>, %arg3: memref<1x32xf32, #tpu.memory_space<vmem>>, %arg4: memref<2x32x32xbf16, #tpu.memory_space<vmem>>, %arg5: memref<2x1x32xf32, #tpu.memory_space<vmem>>, %arg6: memref<32x128xbf16, #tpu.memory_space<vmem>>, %arg7: memref<1x128xf32, #tpu.memory_space<vmem>>, %arg8: memref<8x8xf32, #tpu.memory_space<vmem>>, %arg9: memref<8x128xf32, #tpu.memory_space<vmem>>) attributes {dimension_semantics = [#tpu.dimension_semantics<parallel>], iteration_bounds = array<i64: 1>, scalar_prefetch = 0 : i64, scratch_operands = 0 : i64, tpu.core_type = #tpu.core_type<tc>, window_params = [{transform_indices = @transform_0, window_bounds = array<i64: 8, 8>}, {pipeline_mode = #tpu.pipeline_mode<synchronous>, transform_indices = @transform_1, window_bounds = array<i64: 8, 32>}, {pipeline_mode = #tpu.pipeline_mode<synchronous>, transform_indices = @transform_2, window_bounds = array<i64: 1, 32>}, {pipeline_mode = #tpu.pipeline_mode<synchronous>, transform_indices = @transform_3, window_bounds = array<i64: 2, 32, 32>}, {pipeline_mode = #tpu.pipeline_mode<synchronous>, transform_indices = @transform_4, window_bounds = array<i64: 2, 1, 32>}, {pipeline_mode = #tpu.pipeline_mode<synchronous>, transform_indices = @transform_5, window_bounds = array<i64: 32, 128>}, {pipeline_mode = #tpu.pipeline_mode<synchronous>, transform_indices = @transform_6, window_bounds = array<i64: 1, 128>}, {transform_indices = @transform_7, window_bounds = array<i64: 8, 8>}, {transform_indices = @transform_8, window_bounds = array<i64: 8, 128>}]} {
    %c0 = arith.constant 0 : index
    %c0_0 = arith.constant 0 : index
    %0 = vector.load %arg1[%c0, %c0_0] : memref<8x8xf32, #tpu.memory_space<vmem>>, vector<8x8xf32>
    %1 = arith.cmpf one, %0, %0 : vector<8x8xf32>
    %cst = arith.constant 0.000000e+00 : f32
    %2 = vector.broadcast %cst : f32 to vector<8x8xf32>
    %3 = arith.select %1, %2, %0 : vector<8x8xi1>, vector<8x8xf32>
    %c0_1 = arith.constant 0 : index
    %c0_2 = arith.constant 0 : index
    %4 = vector.load %arg8[%c0_1, %c0_2] : memref<8x8xf32, #tpu.memory_space<vmem>>, vector<8x8xf32>
    tpu.vector_store %arg8[%c0_1, %c0_2], %3 {strides = array<i32>} : memref<8x8xf32, #tpu.memory_space<vmem>>, vector<8x8xf32>,
    %5 = arith.truncf %3 : vector<8x8xf32> to vector<8x8xbf16>
    %c0_3 = arith.constant 0 : index
    %c0_4 = arith.constant 0 : index
    %6 = vector.load %arg2[%c0_3, %c0_4] : memref<8x32xbf16, #tpu.memory_space<vmem>>, vector<8x32xbf16>
    %cst_5 = arith.constant dense<0.000000e+00> : vector<8x32xf32>
    %7 = tpu.matmul %5, %6, %cst_5 {dimension_numbers = #tpu.dot_dimension_numbers<[1], [0], [0], [1], [0, 0, 1, 1], [], []>} : vector<8x8xbf16>, vector<8x32xbf16>, vector<8x32xf32> -> vector<8x32xf32>
    %c0_6 = arith.constant 0 : index
    %c0_7 = arith.constant 0 : index
    %8 = vector.load %arg3[%c0_6, %c0_7] : memref<1x32xf32, #tpu.memory_space<vmem>>, vector<1x32xf32>
    %9 = vector.broadcast %8 : vector<1x32xf32> to vector<8x32xf32>
    %10 = arith.addf %7, %9 : vector<8x32xf32>
    %c0_i32 = arith.constant 0 : i32
    %11 = arith.truncf %10 : vector<8x32xf32> to vector<8x32xbf16>
    %12 = arith.index_cast %c0_i32 : i32 to index
    %c0_8 = arith.constant 0 : index
    %c0_9 = arith.constant 0 : index
    %13 = vector.load %arg4[%12, %c0_8, %c0_9] : memref<2x32x32xbf16, #tpu.memory_space<vmem>>, vector<1x32x32xbf16>
    %14 = vector.shape_cast %13 : vector<1x32x32xbf16> to vector<32x32xbf16>
    %cst_10 = arith.constant dense<0.000000e+00> : vector<8x32xf32>
    %15 = tpu.matmul %11, %14, %cst_10 {dimension_numbers = #tpu.dot_dimension_numbers<[1], [0], [0], [1], [0, 0, 1, 1], [], []>} : vector<8x32xbf16>, vector<32x32xbf16>, vector<8x32xf32> -> vector<8x32xf32>
    %16 = arith.index_cast %c0_i32 : i32 to index
    %c0_11 = arith.constant 0 : index
    %c0_12 = arith.constant 0 : index
    %17 = vector.load %arg5[%16, %c0_11, %c0_12] : memref<2x1x32xf32, #tpu.memory_space<vmem>>, vector<1x1x32xf32>
    %18 = vector.shape_cast %17 : vector<1x1x32xf32> to vector<1x32xf32>
    %19 = vector.broadcast %18 : vector<1x32xf32> to vector<8x32xf32>
    %20 = arith.addf %15, %19 : vector<8x32xf32>
    %cst_13 = arith.constant 0.000000e+00 : f32
    %21 = vector.broadcast %cst_13 : f32 to vector<8x32xf32>
    %22 = arith.cmpf ogt, %20, %21 : vector<8x32xf32>
    %cst_14 = arith.constant 0.00999999977 : f32
    %23 = vector.broadcast %cst_14 : f32 to vector<8x32xf32>
    %24 = arith.mulf %23, %20 : vector<8x32xf32>
    %25 = arith.select %22, %20, %24 : vector<8x32xi1>, vector<8x32xf32>
    %26 = arith.addf %10, %25 : vector<8x32xf32>
    %c1_i32 = arith.constant 1 : i32
    %27 = arith.truncf %26 : vector<8x32xf32> to vector<8x32xbf16>
    %28 = arith.index_cast %c1_i32 : i32 to index
    %c0_15 = arith.constant 0 : index
    %c0_16 = arith.constant 0 : index
    %29 = vector.load %arg4[%28, %c0_15, %c0_16] : memref<2x32x32xbf16, #tpu.memory_space<vmem>>, vector<1x32x32xbf16>
    %30 = vector.shape_cast %29 : vector<1x32x32xbf16> to vector<32x32xbf16>
    %cst_17 = arith.constant dense<0.000000e+00> : vector<8x32xf32>
    %31 = tpu.matmul %27, %30, %cst_17 {dimension_numbers = #tpu.dot_dimension_numbers<[1], [0], [0], [1], [0, 0, 1, 1], [], []>} : vector<8x32xbf16>, vector<32x32xbf16>, vector<8x32xf32> -> vector<8x32xf32>
    %32 = arith.index_cast %c1_i32 : i32 to index
    %c0_18 = arith.constant 0 : index
    %c0_19 = arith.constant 0 : index
    %33 = vector.load %arg5[%32, %c0_18, %c0_19] : memref<2x1x32xf32, #tpu.memory_space<vmem>>, vector<1x1x32xf32>
    %34 = vector.shape_cast %33 : vector<1x1x32xf32> to vector<1x32xf32>
    %35 = vector.broadcast %34 : vector<1x32xf32> to vector<8x32xf32>
    %36 = arith.addf %31, %35 : vector<8x32xf32>
    %cst_20 = arith.constant 0.000000e+00 : f32
    %37 = vector.broadcast %cst_20 : f32 to vector<8x32xf32>
    %38 = arith.cmpf ogt, %36, %37 : vector<8x32xf32>
    %cst_21 = arith.constant 0.00999999977 : f32
    %39 = vector.broadcast %cst_21 : f32 to vector<8x32xf32>
    %40 = arith.mulf %39, %36 : vector<8x32xf32>
    %41 = arith.select %38, %36, %40 : vector<8x32xi1>, vector<8x32xf32>
    %42 = arith.addf %26, %41 : vector<8x32xf32>
    %c2_i32 = arith.constant 2 : i32
    %43 = arith.truncf %42 : vector<8x32xf32> to vector<8x32xbf16>
    %c0_22 = arith.constant 0 : index
    %c0_23 = arith.constant 0 : index
    %44 = vector.load %arg6[%c0_22, %c0_23] : memref<32x128xbf16, #tpu.memory_space<vmem>>, vector<32x128xbf16>
    %cst_24 = arith.constant dense<0.000000e+00> : vector<8x128xf32>
    %45 = tpu.matmul %43, %44, %cst_24 {dimension_numbers = #tpu.dot_dimension_numbers<[1], [0], [0], [1], [0, 0, 1, 1], [], []>} : vector<8x32xbf16>, vector<32x128xbf16>, vector<8x128xf32> -> vector<8x128xf32>
    %c0_25 = arith.constant 0 : index
    %c0_26 = arith.constant 0 : index
    %46 = vector.load %arg7[%c0_25, %c0_26] : memref<1x128xf32, #tpu.memory_space<vmem>>, vector<1x128xf32>
    %47 = vector.broadcast %46 : vector<1x128xf32> to vector<8x128xf32>
    %48 = arith.addf %45, %47 : vector<8x128xf32>
    %c0_27 = arith.constant 0 : index
    %c0_28 = arith.constant 0 : index
    %49 = vector.load %arg9[%c0_27, %c0_28] : memref<8x128xf32, #tpu.memory_space<vmem>>, vector<8x128xf32>
    tpu.vector_store %arg9[%c0_27, %c0_28], %48 {strides = array<i32>} : memref<8x128xf32, #tpu.memory_space<vmem>>, vector<8x128xf32>,
    return
  }
  func.func @transform_0(%arg0: i32) -> (i32, i32) {
    %c0_i32 = arith.constant 0 : i32
    %c0_i32_0 = arith.constant 0 : i32
    return %arg0, %c0_i32 : i32, i32
  }
  func.func @transform_1(%arg0: i32) -> (i32, i32) {
    %c0_i32 = arith.constant 0 : i32
    %c0_i32_0 = arith.constant 0 : i32
    %c0_i32_1 = arith.constant 0 : i32
    return %c0_i32, %c0_i32_0 : i32, i32
  }
  func.func @transform_2(%arg0: i32) -> (i32, i32) {
    %c0_i32 = arith.constant 0 : i32
    %c0_i32_0 = arith.constant 0 : i32
    %c0_i32_1 = arith.constant 0 : i32
    return %c0_i32, %c0_i32_0 : i32, i32
  }
  func.func @transform_3(%arg0: i32) -> (i32, i32, i32) {
    %c0_i32 = arith.constant 0 : i32
    %c0_i32_0 = arith.constant 0 : i32
    %c0_i32_1 = arith.constant 0 : i32
    %c0_i32_2 = arith.constant 0 : i32
    return %c0_i32, %c0_i32_0, %c0_i32_1 : i32, i32, i32
  }
  func.func @transform_4(%arg0: i32) -> (i32, i32, i32) {
    %c0_i32 = arith.constant 0 : i32
    %c0_i32_0 = arith.constant 0 : i32
    %c0_i32_1 = arith.constant 0 : i32
    %c0_i32_2 = arith.constant 0 : i32
    return %c0_i32, %c0_i32_0, %c0_i32_1 : i32, i32, i32
  }
  func.func @transform_5(%arg0: i32) -> (i32, i32) {
    %c0_i32 = arith.constant 0 : i32
    %c0_i32_0 = arith.constant 0 : i32
    %c0_i32_1 = arith.constant 0 : i32
    return %c0_i32, %c0_i32_0 : i32, i32
  }
  func.func @transform_6(%arg0: i32) -> (i32, i32) {
    %c0_i32 = arith.constant 0 : i32
    %c0_i32_0 = arith.constant 0 : i32
    %c0_i32_1 = arith.constant 0 : i32
    return %c0_i32, %c0_i32_0 : i32, i32
  }
  func.func @transform_7(%arg0: i32) -> (i32, i32) {
    %c0_i32 = arith.constant 0 : i32
    %c0_i32_0 = arith.constant 0 : i32
    return %arg0, %c0_i32 : i32, i32
  }
  func.func @transform_8(%arg0: i32) -> (i32, i32) {
    %c0_i32 = arith.constant 0 : i32
    %c0_i32_0 = arith.constant 0 : i32
    return %arg0, %c0_i32 : i32, i32
  }
}

</mosaic_0001>

<bundles_post_ra>
// kernel: mlp_res_forward.1
= control target key start
LH: loop header
LB: loop body
LE: loop exit
PB: predicated region body
PF: predicated region fallthrough
CT: control target
= control target key end

     0   :  { %14 = vsyncpa [#allocation3], 0  ;;  %vm48_vm0 = vcmask 1043456   ;;  %v447_v2 = vmov 0.0   ;;  %vm448_vm1 = vmmov 0   ;;  %vm34_vm3 = vcmask 64512   ;;  %s545_s0 = inlined_call_operand.vmem [shape: f32[8,8], index: 0, kind: input, shape index: {}]   ;;  %s546_s1 = inlined_call_operand.vmem [shape: bf16[8,32], index: 1, kind: input, shape index: {}]   ;;  %s547_s2 = inlined_call_operand.vmem [shape: f32[1,32], index: 2, kind: input, shape index: {}]   ;;  %s548_s3 = inlined_call_operand.vmem [shape: bf16[2,32,32], index: 3, kind: input, shape index: {}]   ;;  %s549_s4 = inlined_call_operand.vmem [shape: f32[2,1,32], index: 4, kind: input, shape index: {}]   ;;  %s550_s5 = inlined_call_operand.vmem [shape: bf16[32,128], index: 5, kind: input, shape index: {}]   ;;  %s551_s6 = inlined_call_operand.vmem [shape: f32[1,128], index: 6, kind: input, shape index: {}]   ;;  %s552_s7 = inlined_call_operand.hbm [shape: f32[8,8], index: 7, kind: output, shape index: {0}]   ;;  %s553_s8 = inlined_call_operand.hbm [shape: f32[8,128], index: 8, kind: output, shape index: {1}]  }
   0x1   :  { %v37_v0 = vld [vmem:[%s546_s1] sm:$0xf]  ;;  %363 = vmatprep.subr.bf16.mxu0 %v447_v2  ;;  %365 = vmatprep.mubr.msk.bf16.mxu0 %vm448_vm1, %v447_v2  ;;  %v397_v5 = vld [vmem:[%s548_s3 + $0x8] sm:$0xff]  }
   0x2   :  { %v31_v1 = vld [vmem:[%s545_s0] sm:$0xff]  ;;  %v50_v3 = vsel %vm48_vm0, %v37_v0, 0  ;;  %369 = vmatprep.subr.bf16.mxu1 %v447_v2  ;;  %373 = vmatprep.mubr.msk.bf16.mxu1 %vm448_vm1, %v447_v2 }
   0x3   :  { %vm32_vm2 = vcmp.ne.f32.partialorder %v31_v1, %v31_v1  ;;  %364 = vmatpush3.bf16.msra.mxu0 %v50_v3  ;;  %370 = vmatpush3.bf16.msra.mxu1 %v397_v5 }
   0x4   :  { %v33_v4 = vsel %vm32_vm2, 0.0, %v31_v1  ;;  %377 = vmatprep.subr.bf16.mxu0 %v447_v2  ;;  %371 = vmatprep.subr.bf16.mxu1 %v447_v2 }
   0x5   :  { %v36_v6 = vpack.c.bf16 %v33_v4, %v33_v4  ;;  %35 = vst.msk [vmem:[#allocation2] sm:$0xff] %vm34_vm3, %v33_v4 }
   0x7   :  { %366 = vmatmul.mubr.msk.bf16.vlgmr.msra.gmra.mxu0 %vm34_vm3, %v36_v6 }
   0x8   :  { %381 = vmatprep.mubr.msk.bf16.mxu0 %vm448_vm1, %v447_v2 }
   0x9   :  { %15 = vsyncpa [#allocation5], 0  ;;  %v398_v7 = vld [vmem:[%s548_s3] sm:$0xff]   ;;  %vm116_vm4 = vcmask 261120   ;;  %v399_v15 = vld [vmem:[%s548_s3 + $0x18] sm:$0xff]   ;;  %s449_s23 = smov [#allocation2]  }
   0xa   :  { %372 = vmatpush3.bf16.msra.mxu1 %v398_v7  ;;  %v333_v8 = vld [vmem:[%s547_s2] ss:$0 sm:$0xff]  ;;  %378 = vmatpush3.bf16.msra.mxu0 %v399_v15  ;;  %v400_v16 = vld [vmem:[%s548_s3 + $0x10] sm:$0xff]   ;;  %v401_v27 = vld [vmem:[%s550_s5 + $0x8] sm:$0xff]   ;;  %s311_s24 = sshll.u32 %s449_s23, 4  ;;  %s312_s24 = int_to_ptr.vmem [resolvable:$true] %s311_s24 }
   0xb   :  { %385 = vmatprep.subr.bf16.mxu1 %v447_v2  ;;  %379 = vmatprep.subr.bf16.mxu0 %v447_v2  ;;  %v335_v17 = vld [vmem:[%s549_s4] ss:$0 sm:$0xff]  ;;  %v344_v29 = vld [vmem:[%s549_s4 + $0x1] ss:$0 sm:$0xff]  ;;  %p408_p1 = scmp.lt.s32.totalorder %s312_s24, %s312_s24 }
   0xc   :  { %v402_v28 = vld [vmem:[%s550_s5] sm:$0xff]   ;;  %s403_s5 = scalar_lea.vmem %s312_s24, 128 }
   0xd   :  { %p404_p0 = scmp.ne.s32.totalorder %s312_s24, %s403_s5  ;;  %p409_p2 = scmp.lt.s32.totalorder %s403_s5, %s403_s5 }
   0xe   :  { %380 = vmatpush3.bf16.msra.mxu0 %v400_v16 }
   0xf   :  { %p410_p3 = por %p409_p2, %p408_p1 }
  0x11   :  { %p411_p4 = pnand %p410_p3, %p404_p0 }
  0xc7   :  { %v86_v9 = vpop.f32.mrf.mxu0 }
  0xc8   :  { %v87_v10 = vadd.f32 %v333_v8, %v86_v9 }
  0xc9   :  { %v367_v11 = vpop.f32.mrf.mxu0 }
  0xca   :  { %v92_v12 = vpack.c.bf16 %v87_v10, %v87_v10 }
  0xcb   :  { %v89_v13 = vpop.f32.mrf.mxu0 }
  0xcc   :  { %374 = vmatmul.mubr.msk.bf16.vlgmr.msra.gmra.mxu1 %vm116_vm4, %v92_v12 }
  0xcd   :  { %v368_v14 = vpop.f32.mrf.mxu0  ;;  %389 = vmatprep.mubr.msk.bf16.mxu1 %vm448_vm1, %v447_v2  ;;  %386 = vmatpush3.bf16.msra.mxu1 %v401_v27 }
  0xce   :  { %387 = vmatprep.subr.bf16.mxu1 %v447_v2 }
  0xd1   :  { %388 = vmatpush3.bf16.msra.mxu1 %v402_v28 }
 0x18c   :  { %v154_v18 = vpop.f32.mrf.mxu1 }
 0x18d   :  { %v155_v19 = vadd.f32 %v335_v17, %v154_v18 }
 0x18e   :  { %v375_v20 = vpop.f32.mrf.mxu1 }
 0x18f   :  { %vm160_vm5 = vcmp.gt.f32.partialorder %v155_v19, 0.0  ;;  %v161_v21 = vmul.f32 0.01, %v155_v19 }
 0x190   :  { %v157_v22 = vpop.f32.mrf.mxu1 }
 0x191   :  { %v162_v23 = vsel %vm160_vm5, %v155_v19, %v161_v21 }
 0x192   :  { %v163_v24 = vadd.f32 %v162_v23, %v87_v10  ;;  %v376_v25 = vpop.f32.mrf.mxu1 }
 0x194   :  { %v164_v26 = vpack.c.bf16 %v163_v24, %v163_v24 }
 0x196   :  { %382 = vmatmul.mubr.msk.bf16.vlgmr.msra.gmra.mxu0 %vm116_vm4, %v164_v26 }
 0x256   :  { %v227_v30 = vpop.f32.mrf.mxu0 }
 0x257   :  { %v228_v31 = vadd.f32 %v344_v29, %v227_v30 }
 0x258   :  { %v383_v32 = vpop.f32.mrf.mxu0 }
 0x259   :  { %vm233_vm6 = vcmp.gt.f32.partialorder %v228_v31, 0.0  ;;  %v234_v33 = vmul.f32 0.01, %v228_v31 }
 0x25a   :  { %v230_v34 = vpop.f32.mrf.mxu0 }
 0x25b   :  { %v235_v35 = vsel %vm233_vm6, %v228_v31, %v234_v33 }
 0x25c   :  { %v236_v36 = vadd.f32 %v235_v35, %v163_v24  ;;  %v384_v37 = vpop.f32.mrf.mxu0 }
 0x25e   :  { %v237_v38 = vpack.c.bf16 %v236_v36, %v236_v36 }
 0x260   :  { %390 = vmatmul.mubr.msk.bf16.vlgmr.msra.gmra.mxu1 %vm116_vm4, %v237_v38 }
 0x261   :  { %414 = shalt.err (!%p411_p4)
}
 0x262   :  { %314 = dma.vmem_to_hbm [thread:$0]  %s312_s24, 128, %s552_s7, [#allocation3]   ;;  %v348_v39 = vld [vmem:[%s551_s6] ss:$0 sm:$0xff] }
 0x263   :  { %s450_s28 = smov [#allocation4]  }
 0x264   :  { %s321_s29 = sshll.u32 %s450_s28, 4  ;;  %s322_s29 = int_to_ptr.vmem [resolvable:$true] %s321_s29 }
 0x265   :  { %s423_s30 = scalar_lea.vmem %s322_s29, 128  ;;  %p428_p6 = scmp.lt.s32.totalorder %s322_s29, %s322_s29 }
 0x266   :  { %p424_p5 = scmp.ne.s32.totalorder %s322_s29, %s423_s30  ;;  %p429_p7 = scmp.lt.s32.totalorder %s423_s30, %s423_s30 }
 0x268   :  { %p430_p8 = por %p429_p7, %p428_p6 }
 0x26a   :  { %p431_p9 = pnand %p430_p8, %p424_p5 }
 0x320   :  { %v298_v40 = vpop.f32.mrf.mxu1 }
 0x321   :  { %v299_v41 = vadd.f32 %v348_v39, %v298_v40 }
 0x322   :  { %v391_v42 = vpop.f32.mrf.mxu1 }
 0x323   :  { %304 = vst [vmem:[#allocation4] sm:$0xff] %v299_v41 }
 0x324   :  { %v301_v43 = vpop.f32.mrf.mxu1 }
 0x325   :  { %434 = shalt.err (!%p431_p9)
}
 0x326   :  { %324 = dma.vmem_to_hbm [thread:$0]  %s322_s29, 128, %s553_s8, [#allocation5]   ;;  %v392_v44 = vpop.f32.mrf.mxu1 }
 0x327   :  { %443 = dma.done.wait [#allocation3], 128  }
 0x328   :  { %444 = vsyncadd [#allocation3], 4294967168 }
 0x329   :  { %445 = dma.done.wait [#allocation5], 128  }
 0x32a   :  { %446 = vsyncadd [#allocation5], 4294967168 }
 0x32b   :  { %331 = vsyncpa [#allocation3], 1 }
 0x32c   :  { %332 = vsyncpa [#allocation5], 1 }

</bundles_post_ra>
